<compile_context>
chip_gen: v5e
topology: v5e:2x2
jax: 0.10.0
libtpu: 0.0.40
codegen_flags: <defaults>
</compile_context>

<pallas_src>
import functools

import jax
import jax.numpy as jnp
from jax.experimental import pallas as pl
from jax.experimental.pallas import tpu as pltpu


def _round_up(x, m):
    return ((x + m - 1) // m) * m


def _cdiv(a, b):
    return (a + b - 1) // b


def simplenet_kernel(x_ref, w1_ref, b1_ref, w2_ref, b2_ref, o_ref):
    # Cast x to the matmul operand dtype inside the kernel (cheap VPU cast,
    # avoids a separate wrapper-side cast pass over HBM for the bf16 path).
    x = x_ref[...].astype(w1_ref.dtype)
    # hidden = relu(x @ W1 + b1), accumulated in f32 on the MXU.
    h = jnp.dot(x, w1_ref[...], preferred_element_type=jnp.float32)
    h = jnp.maximum(h + b1_ref[...], 0.0)               # b1 is (1, H_pad) -> broadcast
    # out = h @ W2 + b2
    y = jnp.dot(h.astype(w2_ref.dtype), w2_ref[...],
                preferred_element_type=jnp.float32)
    o_ref[...] = (y + b2_ref[...]).astype(o_ref.dtype)  # b2 is (1, T_out)


def simplenet_forward(x, w1, b1, w2, b2, *, compute_dtype=None, tm_max=512):
    """SimpleNet forward: relu(x @ w1 + b1) @ w2 + b2.

    x: (B, F), w1: (F, H), b1: (H,), w2: (H, T), b2: (T,) -> (B, T).

    compute_dtype: dtype of the matmul operands (e.g. jnp.bfloat16, native on
    the v5e/v6e/v7x MXU). x stays f32 in HBM and is cast in-kernel; biases,
    ReLU and accumulation stay float32.
    """
    B, F = x.shape
    H = w1.shape[1]
    T = w2.shape[1]
    out_dtype = x.dtype
    cd = jnp.dtype(compute_dtype) if compute_dtype is not None else jnp.dtype(x.dtype)

    x_itemsize = jnp.dtype(x.dtype).itemsize
    cd_itemsize = cd.itemsize
    out_itemsize = jnp.dtype(out_dtype).itemsize

    # ---- Lane-dim padding ----------------------------------------------------
    # H is the N of matmul-1, the lane dim of the ReLU activations, and the K
    # of matmul-2: zero-pad to 128 lanes (exact; padded hidden cols are 0).
    # NOTE: 256 alignment would fill the v6e/v7x 2x256x256 MXU better for very
    # large H/T, but can add ~2x padding waste at mid sizes, so keep 128.
    H_pad = _round_up(H, 128)
    # Lane-pad targets only when T is within ~4x of 128; for tiny T the 128-pad
    # amplifies output HBM writeback up to 32x (plus a wrapper slice pass).
    T_out = _round_up(T, 128) if T >= 32 else T

    # ---- Batch tiling --------------------------------------------------------
    row_align = 16 if cd == jnp.bfloat16 else 8
    # Guarantee >= 2 grid steps (v7x megacore + pipelining) and split B evenly
    # to bound batch-padding waste.
    n_tiles = max(2, _cdiv(B, tm_max))
    TM = min(_round_up(_cdiv(B, n_tiles), row_align), _round_up(tm_max, row_align))

    # Cap TM by a conservative per-TensorCore VMEM budget (v7x: 64 MiB per TC,
    # and each TC holds its own copy of the resident weights).
    VMEM_BUDGET = 40 << 20
    weight_bytes = (F * H_pad + H_pad * T_out) * cd_itemsize + (H_pad + T_out) * 4
    bytes_per_row = 2 * F * x_itemsize + 2 * T_out * out_itemsize  # dbl-buffered x + out
    avail = max(VMEM_BUDGET - weight_bytes, bytes_per_row * row_align)
    tm_cap = max(row_align, (avail // bytes_per_row) // row_align * row_align)
    TM = min(TM, tm_cap)

    grid_n = max(2, _cdiv(B, TM))
    B_pad = grid_n * TM

    # ---- Operand padding / dtype prep ---------------------------------------
    x_p = x if B_pad == B else jnp.pad(x, ((0, B_pad - B), (0, 0)))   # stays f32 in HBM
    w1_p = jnp.pad(w1, ((0, 0), (0, H_pad - H))).astype(cd)
    b1_2d = jnp.pad(b1.reshape(1, H), ((0, 0), (0, H_pad - H))).astype(jnp.float32)
    w2_p = jnp.pad(w2, ((0, H_pad - H), (0, T_out - T))).astype(cd)
    b2_2d = jnp.pad(b2.reshape(1, T), ((0, 0), (0, T_out - T))).astype(jnp.float32)

    # ---- BlockSpecs ----------------------------------------------------------
    # x stream: extra pipeline depth only when the grid is long and the tile is
    # tiny (DMA latency not hidden by depth-2).
    x_buf_count = 3 if (grid_n > 2 and TM * F * x_itemsize <= (1 << 20)) else 2
    if x_buf_count == 3:
        x_spec = pl.BlockSpec((TM, F), lambda i: (i, 0), pipeline_mode=pl.Buffered(3))
    else:
        x_spec = pl.BlockSpec((TM, F), lambda i: (i, 0))

    # Resident operands: constant index_map -> single buffer, no pointless
    # double-buffering of the weights.
    resident = functools.partial(pl.BlockSpec, pipeline_mode=pl.Buffered(1))
    in_specs = [
        x_spec,
        resident((F, H_pad), lambda i: (0, 0)),      # W1 (lane-padded) resident
        resident((1, H_pad), lambda i: (0, 0)),      # b1 resident
        resident((H_pad, T_out), lambda i: (0, 0)),  # W2 resident
        resident((1, T_out), lambda i: (0, 0)),      # b2 resident
    ]

    # ---- Explicit VMEM limit (scoped defaults are only 16/32 MiB) -----------
    footprint = (weight_bytes
                 + x_buf_count * TM * F * x_itemsize
                 + 2 * TM * T_out * out_itemsize)
    vmem_limit = min(max(int(1.3 * footprint) + (4 << 20), 32 << 20), 128 << 20)

    cost = pl.CostEstimate(
        flops=2 * B_pad * F * H_pad + 2 * B_pad * H_pad * T_out,
        transcendentals=0,
        bytes_accessed=(B_pad * F * x_itemsize
                        + (F * H_pad + H_pad * T_out) * cd_itemsize
                        + (H_pad + T_out) * 4
                        + B_pad * T_out * out_itemsize),
    )

    # TODO(synk): once single-buffered W1+W2 exceed ~24-32 MiB (v7x per-TC
    # budget), first add a grid axis tiling T_out (W2 columns, no accumulator
    # needed); only add an F-reduction axis (acc scratch + pl.when
    # init/finalize, marked "arbitrary", placed last) if W1 alone overflows.
    out = pl.pallas_call(
        simplenet_kernel,
        out_shape=jax.ShapeDtypeStruct((B_pad, T_out), out_dtype),
        grid_spec=pl.GridSpec(
            grid=(grid_n,),
            in_specs=in_specs,
            out_specs=pl.BlockSpec((TM, T_out), lambda i: (i, 0)),
        ),
        compiler_params=pltpu.CompilerParams(
            dimension_semantics=("parallel",),   # batch rows independent -> megacore
            vmem_limit_bytes=vmem_limit,
        ),
        cost_estimate=cost,
    )(x_p, w1_p, b1_2d, w2_p, b2_2d)

    return out[:B, :T]


def reference_forward(x, w1, b1, w2, b2):
    h = jnp.maximum(x @ w1 + b1, 0.0)
    return h @ w2 + b2


def _make_inputs(key, batch, n_features, size_hidden, n_targets):
    kx, kw1, kb1, kw2, kb2 = jax.random.split(key, 5)
    x = jax.random.normal(kx, (batch, n_features), dtype=jnp.float32)
    # Mimic torch.nn.Linear's U(-1/sqrt(fan_in), 1/sqrt(fan_in)) init.
    bound1 = 1.0 / (n_features ** 0.5)
    w1 = jax.random.uniform(kw1, (n_features, size_hidden), jnp.float32, -bound1, bound1)
    b1 = jax.random.uniform(kb1, (size_hidden,), jnp.float32, -bound1, bound1)
    bound2 = 1.0 / (size_hidden ** 0.5)
    w2 = jax.random.uniform(kw2, (size_hidden, n_targets), jnp.float32, -bound2, bound2)
    b2 = jax.random.uniform(kb2, (size_hidden,) if False else (n_targets,),
                            jnp.float32, -bound2, bound2)
    return x, w1, b1, w2, b2


if __name__ == "__main__":
    root = jax.random.PRNGKey(0)
    k1, k2 = jax.random.split(root)

    # Config 1: SimpleNet defaults (size_hidden=100), tiny target dim (T=4)
    # -> exercises the unpadded-T output path and the H=100 -> 128 lane pad.
    x, w1, b1, w2, b2 = _make_inputs(k1, batch=8, n_features=16,
                                     size_hidden=100, n_targets=4)
    ref = reference_forward(x, w1, b1, w2, b2)

    out = simplenet_forward(x, w1, b1, w2, b2)
    jax.block_until_ready(out)
    assert out.shape == (8, 4)
    assert jnp.allclose(out, ref, atol=1e-5, rtol=1e-5), "f32 mismatch (config 1)"

    # bf16-operand / f32-accumulate path (native MXU dtype on v5e/v6e/v7x);
    # x is cast inside the kernel, so tolerance is loose by design.
    out_bf16 = simplenet_forward(x, w1, b1, w2, b2, compute_dtype=jnp.bfloat16)
    jax.block_until_ready(out_bf16)
    assert out_bf16.shape == (8, 4)
    assert jnp.allclose(out_bf16, ref, atol=1e-1, rtol=1e-1), "bf16 mismatch (config 1)"

    # Config 2: uneven batch (padding inside the last tile) + T >= 32
    # -> exercises the lane-padded output path.
    x2, w1b, b1b, w2b, b2b = _make_inputs(k2, batch=20, n_features=24,
                                          size_hidden=100, n_targets=40)
    ref2 = reference_forward(x2, w1b, b1b, w2b, b2b)
    out2 = simplenet_forward(x2, w1b, b1b, w2b, b2b)
    jax.block_until_ready(out2)
    assert out2.shape == (20, 40)
    assert jnp.allclose(out2, ref2, atol=1e-4, rtol=1e-5), "f32 mismatch (config 2)"

    print("KERNEL_OK")
</pallas_src>

<mosaic_0001>
module attributes {stable_mosaic.version = 11 : i64} {
  func.func @simplenet_kernel(%arg0: i32, %arg1: memref<8x16xf32, #tpu.memory_space<vmem>>, %arg2: memref<16x128xf32, #tpu.memory_space<vmem>>, %arg3: memref<1x128xf32, #tpu.memory_space<vmem>>, %arg4: memref<128x4xf32, #tpu.memory_space<vmem>>, %arg5: memref<1x4xf32, #tpu.memory_space<vmem>>, %arg6: memref<8x4xf32, #tpu.memory_space<vmem>>) attributes {dimension_semantics = [#tpu.dimension_semantics<parallel>], iteration_bounds = array<i64: 2>, scalar_prefetch = 0 : i64, scratch_operands = 0 : i64, tpu.core_type = #tpu.core_type<tc>, window_params = [{transform_indices = @transform_0, window_bounds = array<i64: 8, 16>}, {pipeline_mode = #tpu.pipeline_mode<synchronous>, transform_indices = @transform_1, window_bounds = array<i64: 16, 128>}, {pipeline_mode = #tpu.pipeline_mode<synchronous>, transform_indices = @transform_2, window_bounds = array<i64: 1, 128>}, {pipeline_mode = #tpu.pipeline_mode<synchronous>, transform_indices = @transform_3, window_bounds = array<i64: 128, 4>}, {pipeline_mode = #tpu.pipeline_mode<synchronous>, transform_indices = @transform_4, window_bounds = array<i64: 1, 4>}, {transform_indices = @transform_5, window_bounds = array<i64: 8, 4>}]} {
    %c0 = arith.constant 0 : index
    %c0_0 = arith.constant 0 : index
    %0 = vector.load %arg1[%c0, %c0_0] : memref<8x16xf32, #tpu.memory_space<vmem>>, vector<8x16xf32>
    %c0_1 = arith.constant 0 : index
    %c0_2 = arith.constant 0 : index
    %1 = vector.load %arg2[%c0_1, %c0_2] : memref<16x128xf32, #tpu.memory_space<vmem>>, vector<16x128xf32>
    %cst = arith.constant dense<0.000000e+00> : vector<8x128xf32>
    %2 = tpu.matmul %0, %1, %cst {dimension_numbers = #tpu.dot_dimension_numbers<[1], [0], [0], [1], [0, 0, 1, 1], [], []>} : vector<8x16xf32>, vector<16x128xf32>, vector<8x128xf32> -> vector<8x128xf32>
    %c0_3 = arith.constant 0 : index
    %c0_4 = arith.constant 0 : index
    %3 = vector.load %arg3[%c0_3, %c0_4] : memref<1x128xf32, #tpu.memory_space<vmem>>, vector<1x128xf32>
    %4 = vector.broadcast %3 : vector<1x128xf32> to vector<8x128xf32>
    %5 = arith.addf %2, %4 : vector<8x128xf32>
    %cst_5 = arith.constant 0.000000e+00 : f32
    %6 = vector.broadcast %cst_5 : f32 to vector<8x128xf32>
    %7 = arith.maximumf %5, %6 : vector<8x128xf32>
    %c0_6 = arith.constant 0 : index
    %c0_7 = arith.constant 0 : index
    %8 = vector.load %arg4[%c0_6, %c0_7] : memref<128x4xf32, #tpu.memory_space<vmem>>, vector<128x4xf32>
    %cst_8 = arith.constant dense<0.000000e+00> : vector<8x4xf32>
    %9 = tpu.matmul %7, %8, %cst_8 {dimension_numbers = #tpu.dot_dimension_numbers<[1], [0], [0], [1], [0, 0, 1, 1], [], []>} : vector<8x128xf32>, vector<128x4xf32>, vector<8x4xf32> -> vector<8x4xf32>
    %c0_9 = arith.constant 0 : index
    %c0_10 = arith.constant 0 : index
    %10 = vector.load %arg5[%c0_9, %c0_10] : memref<1x4xf32, #tpu.memory_space<vmem>>, vector<1x4xf32>
    %11 = vector.broadcast %10 : vector<1x4xf32> to vector<8x4xf32>
    %12 = arith.addf %9, %11 : vector<8x4xf32>
    %c0_11 = arith.constant 0 : index
    %c0_12 = arith.constant 0 : index
    %13 = vector.load %arg6[%c0_11, %c0_12] : memref<8x4xf32, #tpu.memory_space<vmem>>, vector<8x4xf32>
    tpu.vector_store %arg6[%c0_11, %c0_12], %12 {strides = array<i32>} : memref<8x4xf32, #tpu.memory_space<vmem>>, vector<8x4xf32>,
    return
  }
  func.func @transform_0(%arg0: i32) -> (i32, i32) {
    %c0_i32 = arith.constant 0 : i32
    %c0_i32_0 = arith.constant 0 : i32
    return %arg0, %c0_i32 : i32, i32
  }
  func.func @transform_1(%arg0: i32) -> (i32, i32) {
    %c0_i32 = arith.constant 0 : i32
    %c0_i32_0 = arith.constant 0 : i32
    %c0_i32_1 = arith.constant 0 : i32
    return %c0_i32, %c0_i32_0 : i32, i32
  }
  func.func @transform_2(%arg0: i32) -> (i32, i32) {
    %c0_i32 = arith.constant 0 : i32
    %c0_i32_0 = arith.constant 0 : i32
    %c0_i32_1 = arith.constant 0 : i32
    return %c0_i32, %c0_i32_0 : i32, i32
  }
  func.func @transform_3(%arg0: i32) -> (i32, i32) {
    %c0_i32 = arith.constant 0 : i32
    %c0_i32_0 = arith.constant 0 : i32
    %c0_i32_1 = arith.constant 0 : i32
    return %c0_i32, %c0_i32_0 : i32, i32
  }
  func.func @transform_4(%arg0: i32) -> (i32, i32) {
    %c0_i32 = arith.constant 0 : i32
    %c0_i32_0 = arith.constant 0 : i32
    %c0_i32_1 = arith.constant 0 : i32
    return %c0_i32, %c0_i32_0 : i32, i32
  }
  func.func @transform_5(%arg0: i32) -> (i32, i32) {
    %c0_i32 = arith.constant 0 : i32
    %c0_i32_0 = arith.constant 0 : i32
    return %arg0, %c0_i32 : i32, i32
  }
}

</mosaic_0001>

<bundles_post_ra>
// kernel: tpu_custom_call.1
= control target key start
LH: loop header
LB: loop body
LE: loop exit
PB: predicated region body
PF: predicated region fallthrough
CT: control target
= control target key end

     0   :  { %s405_s18 = smov 0   ;;  %s489_s0 = inlined_call_operand.vmem [shape: f32[16,16], index: 0, kind: input, shape index: {}]   ;;  %s490_s1 = inlined_call_operand.vmem [shape: f32[16,128], index: 1, kind: input, shape index: {}]   ;;  %s491_s2 = inlined_call_operand.vmem [shape: f32[1,128], index: 2, kind: input, shape index: {}]   ;;  %s492_s3 = inlined_call_operand.vmem [shape: f32[128,4], index: 3, kind: input, shape index: {}]   ;;  %s493_s4 = inlined_call_operand.vmem [shape: f32[1,4], index: 4, kind: input, shape index: {}]   ;;  %s494_s5 = inlined_call_operand.vmem [shape: f32[16,4], index: 5, kind: output, shape index: {}]  }
   0x1 LB: > { %s347_s19 = sadd.s32 4294967295, %s373_s18   ;;  %p351_p0 = scmp.ge.s32.totalorder %s373_s18, 1  ;;  %s373_s18 = sphi %s405_s18, %s15_s18  }
   0x2   : > { %p186_p1 = scmp.lt.s32.totalorder %s373_s18, 3 }
   0x4   : > { %p187_p2 = pnand %p351_p0, %p186_p1 }
   0x5   : > { %p212_p3 = scmp.lt.s32.totalorder (!%p187_p2), %s347_s19, 1 }
   0x6   : > { %190 = sbr.rel (%p187_p2) target bundleno = 274 (0x112), region = 40 }
   0xb   : > { %v222_v0 = vld [vmem:[%s490_s1 + $0x8] sm:$0xff]  ;;  %v221_v1 = vld [vmem:[%s490_s1] sm:$0xff]  ;;  %v267_v2 = vld [vmem:[%s492_s3 + $0x78] sm:$0xff]  ;;  %s496_s19 = smov (!%p212_p3, %s347_s19), 1  ;;  %vm227_vm0 = vcmask 130048   ;;  %vm292_vm1 = vcmask 31744  }
   0xc   : > { %245 = vmatpush.msra.mxu0 %v222_v0  ;;  %272 = vmatpush.msra.mxu1 %v267_v2  ;;  %v266_v3 = vld [vmem:[%s492_s3 + $0x70] sm:$0xff]  ;;  %v265_v4 = vld [vmem:[%s492_s3 + $0x68] sm:$0xff]  ;;  %s352_s30 = sshll.u32 %s496_s19, 3  ;;  %v264_v5 = vld [vmem:[%s492_s3 + $0x60] sm:$0xff] }
   0xd   : > { %s215_s10 = scalar_lea.vmem %s489_s0, %s352_s30  ;;  %v263_v7 = vld [vmem:[%s492_s3 + $0x58] sm:$0xff]  ;;  %v262_v8 = vld [vmem:[%s492_s3 + $0x50] sm:$0xff]  ;;  %v261_v9 = vld [vmem:[%s492_s3 + $0x48] sm:$0xff]  ;;  %s219_s21 = scalar_lea.vmem %s494_s5, %s352_s30 }
   0xe   : > { %246 = vmatpush.msra.mxu0 %v221_v1  ;;  %273 = vmatpush.msra.mxu1 %v266_v3  ;;  %v220_v6 = vld [vmem:[%s215_s10] sm:$0xff]  ;;  %v259_v11 = vld [vmem:[%s492_s3 + $0x38] sm:$0xff]  ;;  %v258_v12 = vld [vmem:[%s492_s3 + $0x30] sm:$0xff] }
   0xf   : > { %354 = vmatmul.msk.f32.vlgmr.msra.gmra.mxu0 %vm227_vm0, %v220_v6  ;;  %v260_v10 = vld [vmem:[%s492_s3 + $0x40] sm:$0xff]  ;;  %v257_v13 = vld [vmem:[%s492_s3 + $0x28] sm:$0xff]  ;;  %v255_v15 = vld [vmem:[%s492_s3 + $0x18] sm:$0xff] }
  0x10   : > { %274 = vmatpush.msra.mxu1 %v265_v4  ;;  %v256_v14 = vld [vmem:[%s492_s3 + $0x20] sm:$0xff]  ;;  %v254_v16 = vld [vmem:[%s492_s3 + $0x10] sm:$0xff]  ;;  %v253_v17 = vld [vmem:[%s492_s3 + $0x8] sm:$0xff] }
  0x11   : > { %v252_v18 = vld [vmem:[%s492_s3] sm:$0xff] }
  0x12   : > { %275 = vmatpush.msra.mxu1 %v264_v5  ;;  %v365_v19 = vld [vmem:[%s491_s2] ss:$0 sm:$0xff] }
  0x13   : > { %v366_v23 = vld [vmem:[%s493_s4] ss:$0 sm:$0xff] }
  0x14   : > { %276 = vmatpush.msra.mxu1 %v263_v7 }
  0x16   : > { %277 = vmatpush.msra.mxu1 %v262_v8 }
  0x18   : > { %278 = vmatpush.msra.mxu1 %v261_v9 }
  0x1a   : > { %279 = vmatpush.msra.mxu1 %v260_v10 }
  0x1c   : > { %280 = vmatpush.msra.mxu1 %v259_v11 }
  0x1e   : > { %281 = vmatpush.msra.mxu1 %v258_v12 }
  0x20   : > { %282 = vmatpush.msra.mxu1 %v257_v13 }
  0x22   : > { %283 = vmatpush.msra.mxu1 %v256_v14 }
  0x24   : > { %284 = vmatpush.msra.mxu1 %v255_v15 }
  0x26   : > { %285 = vmatpush.msra.mxu1 %v254_v16 }
  0x28   : > { %286 = vmatpush.msra.mxu1 %v253_v17 }
  0x2a   : > { %287 = vmatpush.msra.mxu1 %v252_v18 }
  0x8c   : > { %v248_v20 = vpop.f32.mrf.mxu0 }
  0x8d   : > { %v249_v21 = vadd.f32 %v365_v19, %v248_v20 }
  0x8f   : > { %v251_v22 = vmax.f32 %v249_v21, 0.0 }
  0x91   : > { %288 = vmatmul.f32.vlgmr.msra.gmra.mxu1 %v251_v22 }
 0x10e   : > { %v289_v24 = vpop.f32.mrf.mxu1 }
 0x10f   : > { %v290_v25 = vadd.f32 %v366_v23, %v289_v24 }
 0x111   : > { %293 = vst.msk [vmem:[%s219_s21] sm:$0xff] %vm292_vm1, %v290_v25 }
 0x112 PF: > { %s15_s18 = sadd.s32 1, %s373_s18  }
 0x113   : > { %p12_p4 = scmp.ge.s32.totalorder %s15_s18, 4  }
 0x115   :  { %14 = sbr.rel (!%p12_p4) target bundleno = 1 (0x1), region = 70 }

</bundles_post_ra>
